<compile_context>
chip_gen: v6e
topology: v6e:2x2x1
jax: 0.10.0
libtpu: 0.0.40
codegen_flags: <defaults>
</compile_context>

<pallas_src>
import functools

import jax
import jax.numpy as jnp
from jax import lax
from jax.experimental import pallas as pl
from jax.experimental.pallas import tpu as pltpu

K = 3            # kernel_size
GN_GROUPS = 2    # nn.GroupNorm(2, C_out)
GN_EPS = 1e-5


def convsc_kernel(xc_ref, w_ref, p_ref, o_ref, *, nb, hw):
    # xc_ref: (CKK, nb*HW) bf16  im2col'd block, samples concatenated on lanes
    # w_ref : (C_out, CKK) bf16  flattened conv weight
    # p_ref : (3, C_out, 1) f32  packed [bias, gamma, beta]
    # o_ref : (C_out, nb*HW)     lane-dense output block
    c_out = w_ref.shape[0]
    gs = c_out // GN_GROUPS
    inv_cnt = 1.0 / float(gs * hw)

    bias = p_ref[0]                                    # (C_out, 1)
    gamma = p_ref[1].reshape(GN_GROUPS, gs, 1)
    beta = p_ref[2].reshape(GN_GROUPS, gs, 1)

    # 3x3 conv for the whole block == ONE MXU matmul (bf16 in, f32 accumulate).
    y = jnp.dot(w_ref[...], xc_ref[...],
                preferred_element_type=jnp.float32) + bias   # (C_out, nb*HW)

    # GroupNorm(GN_GROUPS) per sample: static lane slices (HW is a multiple of
    # 128 -> free), one-pass sum / sum-of-squares stats, folded scale/shift,
    # then SiLU. nb is small, so the static unroll is cheap.
    for n in range(nb):
        ys = y[:, n * hw:(n + 1) * hw]                 # (C_out, HW)
        y3 = ys.reshape(GN_GROUPS, gs, hw)
        s1 = jnp.sum(jnp.sum(y3, axis=2, keepdims=True), axis=1, keepdims=True)
        s2 = jnp.sum(jnp.sum(y3 * y3, axis=2, keepdims=True), axis=1,
                     keepdims=True)
        mean = s1 * inv_cnt
        var = jnp.maximum(s2 * inv_cnt - mean * mean, 0.0)
        rstd = lax.rsqrt(var + GN_EPS)                 # EUP
        scale = gamma * rstd                           # (G, gs, 1)
        shift = beta - mean * scale                    # (G, gs, 1)
        yn = (y3 * scale + shift).reshape(c_out, hw)
        yn = yn * jax.nn.sigmoid(yn)                   # SiLU
        o_ref[:, n * hw:(n + 1) * hw] = yn.astype(o_ref.dtype)


def _im2col_blocks(x, nb, pad):
    """(N, C, H, W) -> (N//nb, C*K*K, nb*H*W); samples of a block are
    concatenated along the lane axis; tap order (c, kh, kw) matches
    w.reshape(C_out, C_in*K*K)."""
    N, C, H, W = x.shape
    xp = jnp.pad(x, ((0, 0), (0, 0), (pad, pad), (pad, pad)))
    taps = []
    for kh in range(K):
        for kw in range(K):
            taps.append(lax.slice(xp, (0, 0, kh, kw), (N, C, kh + H, kw + W)))
    xc = jnp.stack(taps, axis=2)                       # (N, C, K*K, H, W)
    xc = xc.reshape(N // nb, nb, C * K * K, H * W)     # (NB, nb, CKK, HW)
    xc = xc.transpose(0, 2, 1, 3)                      # (NB, CKK, nb, HW)
    return xc.reshape(N // nb, C * K * K, nb * H * W)


def convsc_forward(x, w, b, gamma, beta, *, batch_block=None):
    N, C_in, H, W = x.shape
    C_out = w.shape[0]
    HW = H * W
    CKK = C_in * K * K
    pad = (K - 1) // 2                                 # stride=1 -> padding=1

    # Default to >=2 grid steps so both v7x TensorCores get work and
    # cross-step pipelining exists.
    nb = max(1, N // 2) if batch_block is None else batch_block
    assert N % nb == 0
    n_blocks = N // nb

    # Wrapper-side layout plumbing (plain XLA, done once per call).
    # bf16 MXU operands; GroupNorm/SiLU stay f32 in-kernel.
    # TODO(synk): at production sizes, fuse im2col into the kernel (halo DMA +
    # 9 shifted taps feeding accumulating matmuls), add a spatial grid axis
    # with two-pass GroupNorm stats, and re-derive tiles/vmem_limit_bytes for
    # v7x's 64 MiB VMEM vs 128 MiB on v5e/v6e.
    xc = _im2col_blocks(x.astype(jnp.float32), nb, pad).astype(jnp.bfloat16)
    w2 = w.reshape(C_out, CKK).astype(jnp.bfloat16)
    params = jnp.stack([b, gamma, beta]).astype(jnp.float32).reshape(
        3, C_out, 1)

    kern = functools.partial(convsc_kernel, nb=nb, hw=HW)
    out = pl.pallas_call(
        kern,
        out_shape=jax.ShapeDtypeStruct((n_blocks, C_out, nb * HW), x.dtype),
        grid_spec=pltpu.PrefetchScalarGridSpec(
            num_scalar_prefetch=0,
            grid=(n_blocks,),
            in_specs=[
                pl.BlockSpec((None, CKK, nb * HW), lambda i: (i, 0, 0)),
                pl.BlockSpec((C_out, CKK), lambda i: (0, 0)),
                pl.BlockSpec((3, C_out, 1), lambda i: (0, 0, 0)),
            ],
            out_specs=pl.BlockSpec((None, C_out, nb * HW),
                                   lambda i: (i, 0, 0)),
        ),
        compiler_params=pltpu.CompilerParams(
            dimension_semantics=("parallel",)),
    )(xc, w2, params)

    out = out.reshape(n_blocks, C_out, nb, HW).transpose(0, 2, 1, 3)
    return out.reshape(N, C_out, H, W)


def convsc_reference(x, w, b, gamma, beta):
    """Pure-JAX f32 reference of the same forward pass."""
    y = lax.conv_general_dilated(
        x, w, window_strides=(1, 1), padding=((1, 1), (1, 1)),
        dimension_numbers=("NCHW", "OIHW", "NCHW"))
    y = y + b.reshape(1, -1, 1, 1)
    N, C, H, W = y.shape
    yg = y.reshape(N, GN_GROUPS, (C // GN_GROUPS) * H * W)
    mean = yg.mean(-1, keepdims=True)
    var = ((yg - mean) ** 2).mean(-1, keepdims=True)
    yn = ((yg - mean) / jnp.sqrt(var + GN_EPS)).reshape(N, C, H, W)
    yn = yn * gamma.reshape(1, -1, 1, 1) + beta.reshape(1, -1, 1, 1)
    return yn * jax.nn.sigmoid(yn)


if __name__ == "__main__":
    # ConvSC(C_in=4, C_out=8): kernel_size=3, downsampling/upsampling=False,
    # act_norm=True  ->  stride=1, padding=1.
    N, C_in, C_out, H, W = 2, 4, 8, 16, 16

    key = jax.random.PRNGKey(0)
    kx, kw = jax.random.split(key)

    x = jax.random.normal(kx, (N, C_in, H, W), dtype=jnp.float32)

    # Deterministic parameter init mirroring the module's __init__:
    #   conv.weight ~ trunc_normal(std=0.02), conv.bias = 0,
    #   GroupNorm affine: gamma = 1, beta = 0.
    w = (jax.random.truncated_normal(kw, -2.0, 2.0, (C_out, C_in, K, K))
         * 0.02).astype(jnp.float32)
    b = jnp.zeros((C_out,), jnp.float32)
    gamma = jnp.ones((C_out,), jnp.float32)
    beta = jnp.zeros((C_out,), jnp.float32)

    out = convsc_forward(x, w, b, gamma, beta)
    out = jax.block_until_ready(out)

    ref = convsc_reference(x, w, b, gamma, beta)
    assert out.shape == (N, C_out, H, W)
    # Tolerance loosened vs the pure-f32 reference because the MXU operands
    # are bf16 (accumulation is f32).
    assert jnp.allclose(out, ref, atol=3e-2, rtol=3e-2), \
        f"max abs err {jnp.max(jnp.abs(out - ref))}"

    print("KERNEL_OK")
</pallas_src>

<mosaic_0001>
module attributes {stable_mosaic.version = 11 : i64} {
  func.func @convsc_kernel(%arg0: i32, %arg1: memref<1x36x256xbf16, #tpu.memory_space<vmem>>, %arg2: memref<8x36xbf16, #tpu.memory_space<vmem>>, %arg3: memref<3x8x1xf32, #tpu.memory_space<vmem>>, %arg4: memref<1x8x256xf32, #tpu.memory_space<vmem>>) attributes {dimension_semantics = [#tpu.dimension_semantics<parallel>], iteration_bounds = array<i64: 2>, scalar_prefetch = 0 : i64, scratch_operands = 0 : i64, tpu.core_type = #tpu.core_type<tc>, window_params = [{transform_indices = @transform_0, window_bounds = array<i64: 1, 36, 256>}, {pipeline_mode = #tpu.pipeline_mode<synchronous>, transform_indices = @transform_1, window_bounds = array<i64: 8, 36>}, {pipeline_mode = #tpu.pipeline_mode<synchronous>, transform_indices = @transform_2, window_bounds = array<i64: 3, 8, 1>}, {transform_indices = @transform_3, window_bounds = array<i64: 1, 8, 256>}]} {
    %c0 = arith.constant 0 : index
    %c0_0 = arith.constant 0 : index
    %c0_1 = arith.constant 0 : index
    %0 = vector.load %arg3[%c0, %c0_0, %c0_1] : memref<3x8x1xf32, #tpu.memory_space<vmem>>, vector<1x8x1xf32>
    %1 = vector.shape_cast %0 : vector<1x8x1xf32> to vector<8x1xf32>
    %c1 = arith.constant 1 : index
    %c0_2 = arith.constant 0 : index
    %c0_3 = arith.constant 0 : index
    %2 = vector.load %arg3[%c1, %c0_2, %c0_3] : memref<3x8x1xf32, #tpu.memory_space<vmem>>, vector<1x8x1xf32>
    %3 = vector.shape_cast %2 : vector<1x8x1xf32> to vector<8x1xf32>
    %4 = vector.shape_cast %3 : vector<8x1xf32> to vector<2x4x1xf32>
    %c2 = arith.constant 2 : index
    %c0_4 = arith.constant 0 : index
    %c0_5 = arith.constant 0 : index
    %5 = vector.load %arg3[%c2, %c0_4, %c0_5] : memref<3x8x1xf32, #tpu.memory_space<vmem>>, vector<1x8x1xf32>
    %6 = vector.shape_cast %5 : vector<1x8x1xf32> to vector<8x1xf32>
    %7 = vector.shape_cast %6 : vector<8x1xf32> to vector<2x4x1xf32>
    %c0_6 = arith.constant 0 : index
    %c0_7 = arith.constant 0 : index
    %8 = vector.load %arg2[%c0_6, %c0_7] : memref<8x36xbf16, #tpu.memory_space<vmem>>, vector<8x36xbf16>
    %c0_8 = arith.constant 0 : index
    %c0_9 = arith.constant 0 : index
    %c0_10 = arith.constant 0 : index
    %9 = vector.load %arg1[%c0_8, %c0_9, %c0_10] : memref<1x36x256xbf16, #tpu.memory_space<vmem>>, vector<1x36x256xbf16>
    %10 = vector.shape_cast %9 : vector<1x36x256xbf16> to vector<36x256xbf16>
    %cst = arith.constant dense<0.000000e+00> : vector<8x256xf32>
    %11 = tpu.matmul %8, %10, %cst {dimension_numbers = #tpu.dot_dimension_numbers<[1], [0], [0], [1], [0, 0, 1, 1], [], []>} : vector<8x36xbf16>, vector<36x256xbf16>, vector<8x256xf32> -> vector<8x256xf32>
    %12 = vector.broadcast %1 : vector<8x1xf32> to vector<8x256xf32>
    %13 = arith.addf %11, %12 : vector<8x256xf32>
    %14 = vector.shape_cast %13 : vector<8x256xf32> to vector<2x4x256xf32>
    %cst_11 = arith.constant dense<0.000000e+00> : vector<2x4xf32>
    %15 = vector.multi_reduction <add>, %14, %cst_11 [2] : vector<2x4x256xf32> to vector<2x4xf32>
    %16 = vector.shape_cast %15 : vector<2x4xf32> to vector<2x4x1xf32>
    %cst_12 = arith.constant dense<0.000000e+00> : vector<2x1xf32>
    %17 = vector.multi_reduction <add>, %16, %cst_12 [1] : vector<2x4x1xf32> to vector<2x1xf32>
    %18 = vector.shape_cast %17 : vector<2x1xf32> to vector<2x1x1xf32>
    %19 = arith.mulf %14, %14 : vector<2x4x256xf32>
    %cst_13 = arith.constant dense<0.000000e+00> : vector<2x4xf32>
    %20 = vector.multi_reduction <add>, %19, %cst_13 [2] : vector<2x4x256xf32> to vector<2x4xf32>
    %21 = vector.shape_cast %20 : vector<2x4xf32> to vector<2x4x1xf32>
    %cst_14 = arith.constant dense<0.000000e+00> : vector<2x1xf32>
    %22 = vector.multi_reduction <add>, %21, %cst_14 [1] : vector<2x4x1xf32> to vector<2x1xf32>
    %23 = vector.shape_cast %22 : vector<2x1xf32> to vector<2x1x1xf32>
    %cst_15 = arith.constant 9.765625E-4 : f32
    %24 = vector.broadcast %cst_15 : f32 to vector<2x1x1xf32>
    %25 = arith.mulf %18, %24 : vector<2x1x1xf32>
    %cst_16 = arith.constant 9.765625E-4 : f32
    %26 = vector.broadcast %cst_16 : f32 to vector<2x1x1xf32>
    %27 = arith.mulf %23, %26 : vector<2x1x1xf32>
    %28 = arith.mulf %25, %25 : vector<2x1x1xf32>
    %29 = arith.subf %27, %28 : vector<2x1x1xf32>
    %cst_17 = arith.constant 0.000000e+00 : f32
    %30 = vector.broadcast %cst_17 : f32 to vector<2x1x1xf32>
    %31 = arith.maximumf %29, %30 : vector<2x1x1xf32>
    %cst_18 = arith.constant 9.99999974E-6 : f32
    %32 = vector.broadcast %cst_18 : f32 to vector<2x1x1xf32>
    %33 = arith.addf %31, %32 : vector<2x1x1xf32>
    %34 = math.rsqrt %33 : vector<2x1x1xf32>
    %35 = vector.broadcast %34 : vector<2x1x1xf32> to vector<2x4x1xf32>
    %36 = arith.mulf %4, %35 : vector<2x4x1xf32>
    %37 = vector.broadcast %25 : vector<2x1x1xf32> to vector<2x4x1xf32>
    %38 = arith.mulf %37, %36 : vector<2x4x1xf32>
    %39 = arith.subf %7, %38 : vector<2x4x1xf32>
    %40 = vector.broadcast %36 : vector<2x4x1xf32> to vector<2x4x256xf32>
    %41 = arith.mulf %14, %40 : vector<2x4x256xf32>
    %42 = vector.broadcast %39 : vector<2x4x1xf32> to vector<2x4x256xf32>
    %43 = arith.addf %41, %42 : vector<2x4x256xf32>
    %44 = vector.shape_cast %43 : vector<2x4x256xf32> to vector<8x256xf32>
    %45 = arith.negf %44 : vector<8x256xf32>
    %46 = math.exp %45 : vector<8x256xf32>
    %cst_19 = arith.constant 1.000000e+00 : f32
    %47 = vector.broadcast %cst_19 : f32 to vector<8x256xf32>
    %48 = arith.addf %47, %46 : vector<8x256xf32>
    %49 = arith.divf %47, %48 : vector<8x256xf32>
    %50 = arith.mulf %44, %49 : vector<8x256xf32>
    %c0_20 = arith.constant 0 : index
    %c0_21 = arith.constant 0 : index
    %c0_22 = arith.constant 0 : index
    %51 = vector.load %arg4[%c0_20, %c0_21, %c0_22] : memref<1x8x256xf32, #tpu.memory_space<vmem>>, vector<1x8x256xf32>
    %52 = vector.shape_cast %51 : vector<1x8x256xf32> to vector<8x256xf32>
    %53 = vector.shape_cast %50 : vector<8x256xf32> to vector<1x8x256xf32>
    tpu.vector_store %arg4[%c0_20, %c0_21, %c0_22], %53 {strides = array<i32>} : memref<1x8x256xf32, #tpu.memory_space<vmem>>, vector<1x8x256xf32>,
    return
  }
  func.func @transform_0(%arg0: i32) -> (i32, i32, i32) {
    %c0_i32 = arith.constant 0 : i32
    %c0_i32_0 = arith.constant 0 : i32
    %c0_i32_1 = arith.constant 0 : i32
    return %arg0, %c0_i32, %c0_i32_0 : i32, i32, i32
  }
  func.func @transform_1(%arg0: i32) -> (i32, i32) {
    %c0_i32 = arith.constant 0 : i32
    %c0_i32_0 = arith.constant 0 : i32
    %c0_i32_1 = arith.constant 0 : i32
    return %c0_i32, %c0_i32_0 : i32, i32
  }
  func.func @transform_2(%arg0: i32) -> (i32, i32, i32) {
    %c0_i32 = arith.constant 0 : i32
    %c0_i32_0 = arith.constant 0 : i32
    %c0_i32_1 = arith.constant 0 : i32
    %c0_i32_2 = arith.constant 0 : i32
    return %c0_i32, %c0_i32_0, %c0_i32_1 : i32, i32, i32
  }
  func.func @transform_3(%arg0: i32) -> (i32, i32, i32) {
    %c0_i32 = arith.constant 0 : i32
    %c0_i32_0 = arith.constant 0 : i32
    %c0_i32_1 = arith.constant 0 : i32
    return %arg0, %c0_i32, %c0_i32_0 : i32, i32, i32
  }
}

</mosaic_0001>

<bundles_post_ra>
// kernel: tpu_custom_call.1
= control target key start
LH: loop header
LB: loop body
LE: loop exit
PB: predicated region body
PF: predicated region fallthrough
CT: control target
= control target key end

     0   :  { %8 = vsyncpa [#allocation3], 0  ;;  %s810_s0 = inlined_call_operand.vmem [shape: bf16[2,36,256], index: 0, kind: input, shape index: {}]   ;;  %s811_s1 = inlined_call_operand.vmem [shape: bf16[8,36], index: 1, kind: input, shape index: {}]   ;;  %s812_s2 = inlined_call_operand.vmem [shape: f32[3,8,1], index: 2, kind: input, shape index: {}]   ;;  %s813_s3 = inlined_call_operand.hbm [shape: f32[2,8,256], index: 3, kind: output, shape index: {}]  }
   0x1   :  { %10 = vsyncpa [#allocation3 + $0x1], 0  ;;  %s681_s12 = smov 0   ;;  %s683_s13 = smov 0  }
   0x2   :  { %s685_s14 = smov 0   ;;  %s687_s15 = smov 0  }
   0x3 LB: > { %s702_s16 = sadd.s32 4294967295, %s656_s15   ;;  %s504_s17 = sadd.s32 4294967294, %s656_s15   ;;  %s656_s15 = sphi %s687_s15, %s819_s15   ;;  %s652_s14 = sphi %s685_s14, %s818_s14   ;;  %s648_s13 = sphi %s683_s13, %s817_s13   ;;  %s644_s12 = sphi %s681_s12, %s816_s12  }
   0x4   : > { %s706_s18 = sadd.s32 1, %s656_s15   ;;  %s91_s19 = sadd.s32 1, %s652_s14 }
   0x5   : > { %s88_s20 = ssub.s32 %s656_s15, %s706_s18  ;;  %p101_p0 = scmp.ne.s32.totalorder %s652_s14, %s648_s13 }
   0x6   : > { %p89_p1 = scmp.eq.s32.totalorder %s88_s20, 0  ;;  %p102_p2 = scmp.eq.s32.totalorder %s702_s16, 1 }
   0x7   : > { %p107_p3 = scmp.ne.s32.totalorder %s648_s13, %s644_s12  ;;  %p108_p4 = scmp.eq.s32.totalorder %s504_s17, 1 }
   0x8   : > { %s717_s21 = scalar_select %p89_p1, %s652_s14, %s91_s19  }
   0x9   : > { %p719_p5 = por %p102_p2, %p101_p0  ;;  %p723_p6 = por %p108_p4, %p107_p3 }
   0xa   : > { %p507_p7 = scmp.ge.s32.totalorder %s656_s15, 1  ;;  %p140_p8 = scmp.lt.s32.totalorder %s656_s15, 3 }
   0xc   : > { %p141_p9 = pnand %p507_p7, %p140_p8 }
   0xd   : > { %p164_p10 = scmp.lt.s32.totalorder (!%p141_p9), %s702_s16, 1  ;;  %s161_s10 = sand.u32 (!%p141_p9), 1, %s648_s13  }
   0xe   : > { %144 = sbr.rel (%p141_p9) target bundleno = 607 (0x25f), region = 32  ;;  %s508_s11 = sshll.u32 (!%p141_p9), %s161_s10, 4 }
   0xf   : > { %s529_s17 = sshll.u32 (!%p141_p9), %s702_s16, 8  ;;  %s163_s19 = scalar_lea.vmem (!%p141_p9), [#allocation2], %s508_s11 }
  0x10   : > { %s445_s20 = sshll.u32 (!%p141_p9), %s163_s19, 4  ;;  %s446_s20 = int_to_ptr.vmem [resolvable:$true] %s445_s20 }
  0x11   : > { %s596_s28 = scalar_lea.vmem (!%p141_p9), %s446_s20, 256 }
  0x12   : > { %p597_p11 = scmp.ne.s32.totalorder (!%p141_p9), %s446_s20, %s596_s28 }
  0x13   : > { %v658_v0 = vmov 0   ;;  %v170_v1 = vld [vmem:[%s812_s2] sm:$0xff]  ;;  %s165_s26 = scalar_select %p164_p10, %s702_s16, 1  ;;  %vm221_vm0 = vcmask 1041408   ;;  %vm217_vm1 = vcmask 293888   ;;  %vm279_vm2 = vcmask 1043456  }
  0x14   : > { %260 = vmatprep.mubr.bf16.mxu0 %v658_v0  ;;  %572 = vset.pattern.permute.xlu0 %v658_v0  ;;  %v181_v10 = vld [vmem:[%s811_s1] sm:$0xf]  ;;  %p598_p12 = pnand %p597_p11, %p719_p5  ;;  %s660_s16 = smov [#allocation2]  }
  0x15   : > { %189 = vperm.xlu0 %572, %v170_v1   ;;  %573 = vset.pattern.permute.xlu1 %v658_v0  ;;  %s530_s27 = smul.u32 40, %s165_s26  ;;  %s775_s26 = scalar_lea.hbm %s813_s3, %s529_s17 }
  0x16   : > { %p599_p13 = pneg %p598_p12  ;;  %s600_s29 = sshll.u32 %s660_s16, 4  ;;  %s601_s29 = int_to_ptr.vmem [resolvable:$false] %s600_s29 }
  0x17   : > { %s168_s30 = scalar_lea.vmem %s810_s0, %s530_s27  ;;  %s431_s27 = scalar_lea.sflag [#allocation3], %s161_s10 }
  0x18   : > { %v186_v2 = vld [vmem:[%s168_s30 + $0x20] sm:$0x33]  ;;  %v576_v5 = vld [vmem:[%s168_s30 + $0x14] ss:$8 sps:$4 sm:$0xff]   ;;  %v578_v7 = vld [vmem:[%s168_s30 + $0x10] ss:$8 sps:$4 sm:$0xff]   ;;  %p603_p0 = scmp.lt.s32.totalorder %s446_s20, %s601_s29 }
  0x19   : > { %v517_v3 = vcombine.high %v186_v2, %v186_v2  ;;  %v516_v4 = vcombine.low %v186_v2, %v186_v2  ;;  %v579_v8 = vld [vmem:[%s168_s30 + $0x4] ss:$8 sps:$4 sm:$0xff]   ;;  %v581_v9 = vld [vmem:[%s168_s30] ss:$8 sps:$4 sm:$0xff]   ;;  %s602_s30 = scalar_lea.vmem %s601_s29, 512 }
  0x1a   : > { %p604_p1 = scmp.lt.s32.totalorder %s602_s30, %s596_s28 }
  0x1b   : > { %518 = vmatprep.subr.msk.bf16.mxu0 %vm221_vm0, %v517_v3  ;;  %v223_v6 = vsel %vm221_vm0, %v516_v4, 0 }
  0x1c   : > { %239 = vmatpush1.bf16.msra.mxu0 %v223_v6  ;;  %p605_p2 = por %p604_p1, %p603_p0 }
  0x1d   : > { %240 = vmatprep.subr.bf16.mxu0 %v576_v5 }
  0x1e   : > { %p606_p3 = pnand %p605_p2, %p599_p13 }
  0x20   : > { %241 = vmatpush1.bf16.msra.mxu0 %v578_v7 }
  0x21   : > { %242 = vmatprep.subr.bf16.mxu0 %v579_v8 }
  0x24   : > { %243 = vmatpush1.bf16.msra.mxu0 %v581_v9 }
  0x27   : > { %519 = vmatmul.mubr.msk.bf16.vlgmr.msra.gmra.mxu0 %vm217_vm1, %v181_v10 }
  0x90   : > { %v190_v11 = vpop.permute.xlu0 %189 }
  0xe7   : > { %v262_v12 = vpop.f32.mrf.mxu0 }
  0xe8   : > { %v263_v14 = vadd.f32 %v262_v12, %v190_v11 }
  0xe9   : > { %v264_v13 = vpop.f32.mrf.mxu0 }
  0xea   : > { %v265_v15 = vadd.f32 %v264_v13, %v190_v11 }
  0xeb   : > { %v266_v16 = vpop.f32.mrf.mxu0 }
  0xec   : > { %v740_v17 = vcombine.high %v263_v14, %v265_v15  ;;  %v521_v18 = vcombine.high %v265_v15, %v265_v15  ;;  %v742_v19 = vcombine.low %v263_v14, %v265_v15  ;;  %v520_v20 = vcombine.low %v265_v15, %v265_v15 }
  0xed   : > { %v267_v21 = vpop.f32.mrf.mxu0 }
  0xee   : > { %v285_v22 = vsel %vm279_vm2, %v740_v17, 0.0  ;;  %v286_v23 = vsel %vm279_vm2, %v521_v18, 0.0  ;;  %v280_v24 = vsel %vm279_vm2, %v742_v19, 0.0  ;;  %v281_v25 = vsel %vm279_vm2, %v520_v20, 0.0  ;;  %v510_v20 = vld [vmem:[%s812_s2 + $0x8] sm:$0xff] }
  0xef   : > { %v287_v26 = vadd.f32 %v286_v23, %v285_v22  ;;  %v282_v27 = vadd.f32 %v281_v25, %v280_v24  ;;  %v304_v28 = vmul.f32 %v742_v19, %v742_v19  ;;  %v305_v29 = vmul.f32 %v740_v17, %v740_v17  ;;  %v511_v25 = vld [vmem:[%s812_s2 + $0x10] sm:$0xff] }
  0xf0   : > { %v174_v23 = vcombine.high %v510_v20, %v510_v20 }
  0xf1   : > { %288 = vadd.xlane.f32.xlu1 %v287_v26  ;;  %283 = vadd.xlane.f32.xlu0 %v282_v27  ;;  %v308_v30 = vcombine.high %v304_v28, %v304_v28  ;;  %v309_v31 = vcombine.high %v305_v29, %v305_v29  ;;  %v312_v32 = vsel %vm279_vm2, %v304_v28, 0.0  ;;  %v317_v36 = vsel %vm279_vm2, %v305_v29, 0.0 }
  0xf2   : > { %v179_v27 = vcombine.high %v511_v25, %v511_v25 }
  0xf3   : > { %v313_v33 = vsel %vm279_vm2, %v308_v30, 0.0  ;;  %v318_v35 = vsel %vm279_vm2, %v309_v31, 0.0 }
  0xf4   : > { %v314_v34 = vadd.f32 %v313_v33, %v312_v32  ;;  %v319_v37 = vadd.f32 %v318_v35, %v317_v36  ;;  %v659_v32 = vmov 839922192  }
  0xf5   : > { %v362_v33 = vunpack.c.l.s4 %v659_v32 }
  0xf6   : > { %315 = vadd.xlane.f32.xlu1 %v314_v34  ;;  %v364_v34 = vlaneseq }
  0xf7   : > { %v363_v35 = vunpack.c.0.s8 %v362_v33 }
  0xf8   : > { %v365_v36 = vshrl.u32 %v364_v34, 7 }
  0xfa   : > { %320 = vadd.xlane.f32.xlu1 %v319_v37 }
 0x17a   : > { %v289_v38 = vpop.xlane.xlu1 %288  ;;  %v284_v39 = vpop.xlane.xlu0 %283 }
 0x17b   : > { %v297_v40 = vsel %vm279_vm2, %v289_v38, 0.0  ;;  %v290_v41 = vsel %vm279_vm2, %v284_v39, 0.0  ;;  %v366_v38 = vsub.s32 %v363_v35, %v365_v36 }
 0x17c   : > { %v298_v42 = vrot.slane %v297_v40, 4  ;;  %v291_v43 = vrot.slane %v290_v41, 4 }
 0x17e   : > { %v299_v44 = vadd.f32 %v298_v42, %v297_v40  ;;  %v292_v45 = vadd.f32 %v291_v43, %v290_v41 }
 0x17f   : > { %v316_v46 = vpop.xlane.xlu1 %315 }
 0x180   : > { %v300_v47 = vrot.slane %v299_v44, 2  ;;  %v293_v48 = vrot.slane %v292_v45, 2  ;;  %v322_v49 = vsel %vm279_vm2, %v316_v46, 0.0 }
 0x181   : > { %v323_v50 = vrot.slane %v322_v49, 4 }
 0x182   : > { %v301_v51 = vadd.f32 %v300_v47, %v299_v44  ;;  %v294_v52 = vadd.f32 %v293_v48, %v292_v45 }
 0x183   : > { %v324_v53 = vadd.f32 %v323_v50, %v322_v49  ;;  %v321_v54 = vpop.xlane.xlu1 %320 }
 0x184   : > { %v295_v55 = vrot.slane %v294_v52, 1  ;;  %v329_v56 = vsel %vm279_vm2, %v321_v54, 0.0  ;;  %v302_v57 = vrot.slane %v301_v51, 1 }
 0x185   : > { %v325_v58 = vrot.slane %v324_v53, 2  ;;  %v330_v59 = vrot.slane %v329_v56, 4 }
 0x186   : > { %v296_v60 = vadd.f32 %v295_v55, %v294_v52  ;;  %v303_v63 = vadd.f32 %v302_v57, %v301_v51 }
 0x187   : > { %v326_v61 = vadd.f32 %v325_v58, %v324_v53  ;;  %v331_v62 = vadd.f32 %v330_v59, %v329_v56 }
 0x188   : > { %v336_v0 = vmul.f32 0.0009765625, %v296_v60  ;;  %v337_v5 = vmul.f32 0.0009765625, %v303_v63 }
 0x189   : > { %v327_v1 = vrot.slane %v326_v61, 1  ;;  %v332_v2 = vrot.slane %v331_v62, 2 }
 0x18a   : > { %v340_v6 = vmul.f32 %v336_v0, %v336_v0  ;;  %v341_v11 = vmul.f32 %v337_v5, %v337_v5 }
 0x18b   : > { %v328_v3 = vadd.f32 %v327_v1, %v326_v61  ;;  %v333_v4 = vadd.f32 %v332_v2, %v331_v62 }
 0x18d   : > { %v338_v7 = vmul.f32 0.0009765625, %v328_v3  ;;  %v334_v8 = vrot.slane %v333_v4, 1 }
 0x18f   : > { %v342_v9 = vsub.f32 %v338_v7, %v340_v6  ;;  %v335_v10 = vadd.f32 %v334_v8, %v333_v4 }
 0x191   : > { %v344_v12 = vmax.f32 %v342_v9, 0.0  ;;  %v339_v13 = vmul.f32 0.0009765625, %v335_v10 }
 0x193   : > { %v346_v14 = vadd.f32 1e-05, %v344_v12  ;;  %v343_v15 = vsub.f32 %v339_v13, %v341_v11 }
 0x195   : > { %584 = vrsqrt.f32 %v346_v14  ;;  %v345_v16 = vmax.f32 %v343_v15, 0.0 }
 0x197   : > { %v347_v18 = vadd.f32 1e-05, %v345_v16 }
 0x199   : > { %586 = vrsqrt.f32 %v347_v18 }
 0x1a2   : > { %v585_v21 = vpop.eup %584 }
 0x1a3   : > { %v350_v22 = vmul.f32 %v585_v21, %v510_v20 }
 0x1a5   : > { %358 = vperm.xlu1 %573, %v350_v22   ;;  %v352_v28 = vmul.f32 %v350_v22, %v336_v0 }
 0x1a6   : > { %v587_v24 = vpop.eup %586 }
 0x1a7   : > { %v351_v26 = vmul.f32 %v587_v24, %v174_v23  ;;  %v354_v31 = vsub.f32 %v511_v25, %v352_v28 }
 0x1a9   : > { %370 = vperm.xlu1 %573, %v351_v26   ;;  %v353_v29 = vmul.f32 %v351_v26, %v337_v5 }
 0x1ab   : > { %v355_v30 = vsub.f32 %v179_v27, %v353_v29 }
 0x1ad   : > { %396 = vperm.xlu0 %572, %v355_v30   ;;  %384 = vperm.xlu1 %573, %v354_v31  }
 0x220   : > { %v359_v37 = vpop.permute.xlu1 %358 }
 0x221   : > { %v367_v40 = vrot.slane %v359_v37, %v366_v38 }
 0x223   : > { %v380_v44 = vmul.f32 %v367_v40, %v742_v19 }
 0x224   : > { %v371_v39 = vpop.permute.xlu1 %370 }
 0x225   : > { %v379_v41 = vrot.slane %v371_v39, %v366_v38 }
 0x227   : > { %v381_v45 = vmul.f32 %v379_v41, %v740_v17 }
 0x228   : > { %v385_v42 = vpop.permute.xlu1 %384  ;;  %v397_v43 = vpop.permute.xlu0 %396 }
 0x229   : > { %v393_v46 = vrot.slane %v385_v42, %v366_v38  ;;  %v405_v47 = vrot.slane %v397_v43, %v366_v38 }
 0x22b   : > { %v406_v48 = vadd.f32 %v393_v46, %v380_v44  ;;  %v407_v49 = vadd.f32 %v405_v47, %v381_v45 }
 0x22d   : > { %v522_v50 = vmul.f32 -1.442695, %v406_v48  ;;  %v523_v51 = vmul.f32 -1.442695, %v407_v49 }
 0x22f   : > { %588 = vpow2.f32 %v522_v50 }
 0x230   : > { %590 = vpow2.f32 %v523_v51 }
 0x23c   : > { %v589_v52 = vpop.eup %588 }
 0x23d   : > { %v591_v53 = vpop.eup %590  ;;  %v414_v54 = vadd.f32 1.0, %v589_v52 }
 0x23e   : > { %v415_v55 = vadd.f32 1.0, %v591_v53 }
 0x23f   : > { %592 = vrcp.f32 %v414_v54 }
 0x240   : > { %594 = vrcp.f32 %v415_v55 }
 0x24c   : > { %v593_v19 = vpop.eup %592 }
 0x24d   : > { %v595_v17 = vpop.eup %594  ;;  %v420_v56 = vmul.f32 %v593_v19, %v406_v48 }
 0x24e   : > { %v421_v57 = vmul.f32 %v595_v17, %v407_v49 }
 0x250   : > { %v424_v58 = vcombine.low %v420_v56, %v421_v57  ;;  %v425_v59 = vcombine.high %v420_v56, %v421_v57 }
 0x252   : > { %428 = vst [vmem:[%s163_s19] sm:$0xff] %v424_v58  ;;  %429 = vst [vmem:[%s163_s19 + $0x8] sm:$0xff] %v425_v59 }
 0x253   : > { %609 = shalt.err (!%p606_p3)
}
 0x254   : > { %s610_s4 = scalar_lea.hbm %s775_s26, 256  ;;  %s614_s7 = scalar_lea.hbm %s813_s3, 512 }
 0x255   : > { %p611_p4 = scmp.ne.s32.totalorder %s775_s26, %s610_s4  ;;  %p615_p9 = scmp.lt.s32.totalorder %s775_s26, %s813_s3 }
 0x256   : > { %p616_p10 = scmp.lt.s32.totalorder %s614_s7, %s610_s4 }
 0x257   : > { %p612_p7 = pnand %p611_p4, %p719_p5 }
 0x258   : > { %p617_p11 = por %p616_p10, %p615_p9 }
 0x259   : > { %p613_p8 = pneg %p612_p7 }
 0x25b   : > { %p618_p12 = pnand %p617_p11, %p613_p8 }
 0x25d   : > { %621 = shalt.err (!%p618_p12)
}
 0x25e   : > { %531 = dma.vmem_to_hbm [thread:$0]  (%p719_p5), %s446_s20, 256, %s775_s26, %s431_s27  }
 0x25f PF: > { %p537_p13 = scmp.ge.s32.totalorder %s656_s15, 2  ;;  %s457_s10 = sand.u32 1, %s644_s12  }
 0x260   : > { %s458_s11 = scalar_lea.sflag [#allocation3], %s457_s10 }
 0x261   : > { %p534_p0 = pnand %p537_p13, %p723_p6 }
 0x263   : > { %p535_p1 = pneg %p534_p0 }
 0x265   : > { %639 = dma.done.wait (%p535_p1), %s458_s11, 256  }
 0x266   : > { %641 = vsyncadd (%p535_p1), %s458_s11, 4294967040  ;;  %p13_p2 = scmp.ge.s32.totalorder %s706_s18, 4   ;;  %s816_s12 = smov %s648_s13 }
 0x267   : > { %s817_s13 = smov %s652_s14  ;;  %s818_s14 = smov %s717_s21 }
 0x268   : > { %s819_s15 = smov %s706_s18  ;;  %15 = sbr.rel (!%p13_p2) target bundleno = 3 (0x3), region = 69 }
 0x26d   :  { %463 = vsyncpa [#allocation3], 1 }
 0x26e   :  { %465 = vsyncpa [#allocation3 + $0x1], 1 }

</bundles_post_ra>
